<compile_context>
chip_gen: v5e
topology: v5e:2x2
jax: 0.10.0
libtpu: 0.0.40
codegen_flags: <defaults>
</compile_context>

<pallas_src>
import functools

import jax
import jax.numpy as jnp
from jax.experimental import pallas as pl
from jax.experimental.pallas import tpu as pltpu


# -----------------------------------------------------------------------------
# Single-shot kernel: whole problem resident in VMEM (the module's actual
# shapes are tiny), one invocation, no grid, no scratch.
# -----------------------------------------------------------------------------
def _kmeans_loss_single_kernel(h_ref, f_ref, out_ref):
    h = h_ref[...]                                           # (N, D) native dtype
    f = f_ref[...]                                           # (N, K)
    # G^T = F^T @ H : contract the shared row (N) axis on the MXU.
    g = jax.lax.dot_general(f, h, (((0,), (0,)), ((), ())),
                            preferred_element_type=jnp.float32)      # (K, D)
    hf = h.astype(jnp.float32)
    sq = jnp.sum(hf * hf, axis=(0, 1), keepdims=True)                # (1, 1)
    out_ref[...] = (sq - jnp.sum(g * g, axis=(0, 1), keepdims=True)
                    ).astype(out_ref.dtype)


# -----------------------------------------------------------------------------
# Streamed kernel for large N: grid = (num_splits, tiles_per_split).
#   axis 0 ("parallel"):  independent partial sums (one per TensorCore on v7x)
#   axis 1 ("arbitrary"): sequential reduction over row tiles
# Accumulates G^T = F^T H in a (K, D) VMEM scratch and sum(H^2) in a (1, 1)
# scalar scratch; emits this split's partial loss on its last reduction step.
# -----------------------------------------------------------------------------
def _kmeans_loss_stream_kernel(h_ref, f_ref, out_ref, g_acc, sq_acc, *,
                               n_rows, row_tile, tiles_per_split, ragged):
    i = pl.program_id(1)                      # reduction step within this split

    @pl.when(i == 0)
    def _init():
        g_acc[...] = jnp.zeros_like(g_acc)
        sq_acc[...] = jnp.zeros_like(sq_acc)

    h = h_ref[...]                            # (row_tile, D)
    f = f_ref[...]                            # (row_tile, K)

    if ragged:
        # Mask out-of-range rows of BOTH operands: this zeroes their
        # contribution to the matmul and to the sum-of-squares term, and
        # neutralises any garbage (even NaN) in the over-read tail rows.
        t = pl.program_id(0) * tiles_per_split + i        # global tile index
        valid = n_rows - t * row_tile                     # rows still in bounds
        row_ids = jax.lax.broadcasted_iota(jnp.int32, (row_tile, 1), 0)
        keep = row_ids < valid
        h = jnp.where(keep, h, jnp.zeros_like(h))
        f = jnp.where(keep, f, jnp.zeros_like(f))

    # MXU: accumulate G^T = F^T @ H over the streamed N dimension.
    g_acc[...] += jax.lax.dot_general(f, h, (((0,), (0,)), ((), ())),
                                      preferred_element_type=jnp.float32)
    # VPU/XLU (free slots next to the MXU): scalar sum-of-squares accumulate.
    hf = h.astype(jnp.float32)
    sq_acc[...] += jnp.sum(hf * hf, axis=(0, 1), keepdims=True)

    @pl.when(i == pl.num_programs(1) - 1)
    def _finalize():
        g = g_acc[...]
        partial = sq_acc[...] - jnp.sum(g * g, axis=(0, 1), keepdims=True)
        out_ref[...] = partial.reshape(out_ref.shape).astype(out_ref.dtype)


def kmeans_loss(h_real, f_mat, *, row_tile=1024, num_splits=1,
                force_stream=False, single_shot_bytes=8 << 20):
    """h_real: (N, D), f_mat: (N, K) -> scalar k-means loss,
    identical (up to fp error) to trace(H H^T) - trace(F^T H H^T F)."""
    N, D = h_real.shape
    Nf, K = f_mat.shape
    assert N == Nf, "h_real and F must share the row dimension"

    total_bytes = (h_real.size * h_real.dtype.itemsize
                   + f_mat.size * f_mat.dtype.itemsize)
    if not force_stream and total_bytes <= single_shot_bytes:
        # Whole problem fits in VMEM: single invocation, zero grid overhead.
        out = pl.pallas_call(
            _kmeans_loss_single_kernel,
            out_shape=jax.ShapeDtypeStruct((1, 1), jnp.float32),
        )(h_real, f_mat)
        return out[0, 0]

    # ---- streamed path (large N) ----
    row_tile = max(8, (row_tile // 8) * 8)            # sublane-aligned tile
    n_tiles = -(-N // row_tile)
    num_splits = int(max(1, min(num_splits, n_tiles)))
    tiles_per_split = -(-n_tiles // num_splits)
    padded_tiles = tiles_per_split * num_splits
    # Ragged if the last real tile is partial OR the split grid has phantom
    # trailing tiles (those are clamped to the last real tile and fully masked).
    ragged = (N % row_tile != 0) or (padded_tiles != n_tiles)

    def tile_map(s, i):
        t = s * tiles_per_split + i
        if padded_tiles != n_tiles:
            t = jnp.minimum(t, n_tiles - 1)           # keep the DMA in-bounds
        return (t, 0)

    kernel = functools.partial(
        _kmeans_loss_stream_kernel, n_rows=N, row_tile=row_tile,
        tiles_per_split=tiles_per_split, ragged=ragged)

    # TODO(synk): if profiling shows exposed DMA at large row_tile, deepen the
    # H input pipeline with pipeline_mode=pl.Buffered(3).
    partials = pl.pallas_call(
        kernel,
        out_shape=jax.ShapeDtypeStruct((num_splits, 1, 1), jnp.float32),
        grid=(num_splits, tiles_per_split),
        in_specs=[pl.BlockSpec((row_tile, D), tile_map),   # H in natural layout
                  pl.BlockSpec((row_tile, K), tile_map)],  # matching F rows
        out_specs=pl.BlockSpec((1, 1, 1), lambda s, i: (s, 0, 0)),
        scratch_shapes=[pltpu.VMEM((K, D), jnp.float32),   # G^T accumulator
                        pltpu.VMEM((1, 1), jnp.float32)],  # scalar sum(H^2)
        compiler_params=pltpu.CompilerParams(
            dimension_semantics=("parallel", "arbitrary"),
            # 48 MiB is safe on every generation (v7x physical VMEM is 64 MiB).
            vmem_limit_bytes=48 << 20),
    )(h_real, f_mat)

    return jnp.sum(partials)


def make_orthogonal(key, rows, cols):
    """JAX equivalent of torch.nn.init.orthogonal_ for rows >= cols."""
    a = jax.random.normal(key, (rows, cols), jnp.float32)
    q, r = jnp.linalg.qr(a)
    signs = jnp.where(jnp.diagonal(r) >= 0.0, 1.0, -1.0)
    return q * signs[None, :]


def kmeans_reference(h_real, f_mat):
    """Literal transcription of the PyTorch forward (builds the N x N Gram)."""
    w = jnp.transpose(h_real)                   # (D, N)
    wtw = h_real @ w                            # (N, N)
    ftwtwf = f_mat.T @ wtw @ f_mat              # (K, K)
    return jnp.trace(wtw) - jnp.trace(ftwtwf)


if __name__ == "__main__":
    # Shapes implied by the module: F has batch_size*150 rows and n_clusters
    # columns; h_real must share F's row count and has a hidden feature dim.
    batch_size, n_hidden, n_clusters = 2, 32, 8
    N = batch_size * 150                        # 300 rows

    key = jax.random.PRNGKey(0)
    k_h, k_f, k_h2, k_f2 = jax.random.split(key, 4)

    h_real = jax.random.normal(k_h, (N, n_hidden), jnp.float32)
    f_mat = make_orthogonal(k_f, N, n_clusters)

    # Module-sized problem -> single-shot VMEM-resident kernel.
    loss = jax.block_until_ready(kmeans_loss(h_real, f_mat))
    ref = kmeans_reference(h_real, f_mat)
    assert loss.shape == ()
    assert jnp.allclose(loss, ref, rtol=5e-3, atol=1e-2), (loss, ref)

    # Exercise the streamed path: ragged last tile + 2-way parallel split
    # (accumulator init/finalize, in-kernel masking, partial-sum outputs).
    N2, D2, K2 = 1000, 128, 16
    h2 = jax.random.normal(k_h2, (N2, D2), jnp.float32)
    f2 = make_orthogonal(k_f2, N2, K2)
    loss2 = jax.block_until_ready(
        kmeans_loss(h2, f2, row_tile=256, num_splits=2, force_stream=True))
    ref2 = kmeans_reference(h2, f2)
    assert jnp.allclose(loss2, ref2, rtol=5e-3, atol=1e-1), (loss2, ref2)

    print("KERNEL_OK")
</pallas_src>

<mosaic_0001>
module attributes {stable_mosaic.version = 11 : i64} {
  func.func @_kmeans_loss_single_kernel(%arg0: memref<300x32xf32, #tpu.memory_space<vmem>>, %arg1: memref<300x8xf32, #tpu.memory_space<vmem>>, %arg2: memref<1x1xf32, #tpu.memory_space<vmem>>) attributes {dimension_semantics = [], scalar_prefetch = 0 : i64, scratch_operands = 0 : i64, tpu.core_type = #tpu.core_type<tc>} {
    %c0 = arith.constant 0 : index
    %c0_0 = arith.constant 0 : index
    %0 = vector.load %arg0[%c0, %c0_0] : memref<300x32xf32, #tpu.memory_space<vmem>>, vector<300x32xf32>
    %c0_1 = arith.constant 0 : index
    %c0_2 = arith.constant 0 : index
    %1 = vector.load %arg1[%c0_1, %c0_2] : memref<300x8xf32, #tpu.memory_space<vmem>>, vector<300x8xf32>
    %cst = arith.constant dense<0.000000e+00> : vector<8x32xf32>
    %2 = tpu.matmul %1, %0, %cst {dimension_numbers = #tpu.dot_dimension_numbers<[0], [0], [1], [1], [0, 1, 1, 1], [], []>} : vector<300x8xf32>, vector<300x32xf32>, vector<8x32xf32> -> vector<8x32xf32>
    %3 = arith.mulf %0, %0 : vector<300x32xf32>
    %4 = vector.shape_cast %3 : vector<300x32xf32> to vector<1x300x32xf32>
    %cst_3 = arith.constant dense<0.000000e+00> : vector<1xf32>
    %5 = vector.multi_reduction <add>, %4, %cst_3 [1, 2] : vector<1x300x32xf32> to vector<1xf32>
    %6 = vector.shape_cast %5 : vector<1xf32> to vector<1x1x1xf32>
    %7 = vector.extract %6[0, 0, 0] : f32 from vector<1x1x1xf32>
    %8 = vector.broadcast %7 : f32 to vector<1x1xf32>
    %9 = arith.mulf %2, %2 : vector<8x32xf32>
    %10 = vector.shape_cast %9 : vector<8x32xf32> to vector<1x8x32xf32>
    %cst_4 = arith.constant dense<0.000000e+00> : vector<1xf32>
    %11 = vector.multi_reduction <add>, %10, %cst_4 [1, 2] : vector<1x8x32xf32> to vector<1xf32>
    %12 = vector.shape_cast %11 : vector<1xf32> to vector<1x1x1xf32>
    %13 = vector.extract %12[0, 0, 0] : f32 from vector<1x1x1xf32>
    %14 = vector.broadcast %13 : f32 to vector<1x1xf32>
    %15 = arith.subf %8, %14 : vector<1x1xf32>
    %c0_5 = arith.constant 0 : index
    %c0_6 = arith.constant 0 : index
    %16 = vector.load %arg2[%c0_5, %c0_6] : memref<1x1xf32, #tpu.memory_space<vmem>>, vector<1x1xf32>
    tpu.vector_store %arg2[%c0_5, %c0_6], %15 {strides = array<i32>} : memref<1x1xf32, #tpu.memory_space<vmem>>, vector<1x1xf32>,
    return
  }
}

</mosaic_0001>

<bundles_post_ra>
// kernel: tpu_custom_call.1
= control target key start
LH: loop header
LB: loop body
LE: loop exit
PB: predicated region body
PF: predicated region fallthrough
CT: control target
= control target key end

     0   :  { %s915_s0 = inlined_call_operand.vmem [shape: f32[300,32], index: 0, kind: input, shape index: {}]   ;;  %s916_s1 = inlined_call_operand.vmem [shape: f32[300,8], index: 1, kind: input, shape index: {}]   ;;  %s917_s2 = inlined_call_operand.hbm [shape: f32[1,1], index: 2, kind: output, shape index: {}]  }
   0x1   :  { %v82_v0 = vld [vmem:[%s916_s1 + $0x100] sm:$0xff]  ;;  %v51_v4 = vld [vmem:[%s916_s1 + $0x8] sm:$0xff] }
   0x2   :  { %v50_v1 = vld [vmem:[%s916_s1] sm:$0xff]  ;;  %152 = vxpose.xlu0.b32.start [1/6] (short) (narrow) %v82_v0, 8  ;;  %v67_v5 = vld [vmem:[%s916_s1 + $0x88] sm:$0xff] }
   0x3   :  { %v66_v2 = vld [vmem:[%s916_s1 + $0x80] sm:$0xff] }
   0x4   :  { %v422_v3 = vpack.i.bf16 %v66_v2, %v50_v1 }
   0x6   :  { %423 = vxpose.xlu1.b32.start [1/16] (narrow) %v422_v3, 8 }
   0x7   :  { %7 = vsyncpa [#allocation3], 0  ;;  %v83_v6 = vld [vmem:[%s916_s1 + $0x108] sm:$0xff]  ;;  %v424_v7 = vpack.i.bf16 %v67_v5, %v51_v4  ;;  %v52_v8 = vld [vmem:[%s916_s1 + $0x10] sm:$0xff]  ;;  %vm188_vm0 = vcmask 1043456   ;;  %vm290_vm1 = vcmask 261120  }
   0x8   :  { %v68_v9 = vld [vmem:[%s916_s1 + $0x90] sm:$0xff]  ;;  %v53_v12 = vld [vmem:[%s916_s1 + $0x18] sm:$0xff]  ;;  %v54_v16 = vld [vmem:[%s916_s1 + $0x20] sm:$0xff]  ;;  %vm184_vm2 = vcmask 359424   ;;  %vm364_vm3 = vcmask 257024   ;;  %s485_s20 = smov [#allocation2]  }
   0x9   :  { %v84_v10 = vld [vmem:[%s916_s1 + $0x110] sm:$0xff]  ;;  %v426_v11 = vpack.i.bf16 %v68_v9, %v52_v8  ;;  %v69_v13 = vld [vmem:[%s916_s1 + $0x98] sm:$0xff]  ;;  %v70_v17 = vld [vmem:[%s916_s1 + $0xa0] sm:$0xff]  ;;  %s397_s21 = sshll.u32 %s485_s20, 4  ;;  %s399_s24 = sshll.u32 %s917_s2, 4  ;;  %vm390_vm4 = vcmask 0   ;;  %s398_s21 = int_to_ptr.vmem [resolvable:$true] %s397_s21  ;;  %s400_s24 = int_to_ptr.hbm [resolvable:$true] %s399_s24 }
   0xa   :  { %153 = vxpose.xlu0.b32.cont [2/6] (short) (narrow) %v83_v6, 8  ;;  %v85_v14 = vld [vmem:[%s916_s1 + $0x118] sm:$0xff]  ;;  %v428_v15 = vpack.i.bf16 %v69_v13, %v53_v12  ;;  %v86_v18 = vld [vmem:[%s916_s1 + $0x120] sm:$0xff]  ;;  %v430_v19 = vpack.i.bf16 %v70_v17, %v54_v16  ;;  %v55_v20 = vld [vmem:[%s916_s1 + $0x28] sm:$0xff] }
   0xb   :  { %v71_v21 = vld [vmem:[%s916_s1 + $0xa8] sm:$0xff]  ;;  %v56_v24 = vld [vmem:[%s916_s1 + $0x30] sm:$0xff]  ;;  %v57_v27 = vld [vmem:[%s916_s1 + $0x38] sm:$0xff] }
   0xc   :  { %v87_v22 = vld [vmem:[%s916_s1 + $0x128] sm:$0xf]  ;;  %v432_v23 = vpack.i.bf16 %v71_v21, %v55_v20  ;;  %v72_v25 = vld [vmem:[%s916_s1 + $0xb0] sm:$0xff]  ;;  %v73_v28 = vld [vmem:[%s916_s1 + $0xb8] sm:$0xff] }
   0xd   :  { %v434_v26 = vpack.i.bf16 %v72_v25, %v56_v24  ;;  %v436_v29 = vpack.i.bf16 %v73_v28, %v57_v27  ;;  %v58_v30 = vld [vmem:[%s916_s1 + $0x40] sm:$0xff]  ;;  %v59_v33 = vld [vmem:[%s916_s1 + $0x48] sm:$0xff]  ;;  %v60_v36 = vld [vmem:[%s916_s1 + $0x50] sm:$0xff] }
   0xe   :  { %425 = vxpose.xlu1.b32.cont [2/16] (narrow) %v424_v7, 8  ;;  %v74_v31 = vld [vmem:[%s916_s1 + $0xc0] sm:$0xff]  ;;  %v75_v34 = vld [vmem:[%s916_s1 + $0xc8] sm:$0xff]  ;;  %v76_v37 = vld [vmem:[%s916_s1 + $0xd0] sm:$0xff] }
   0xf   :  { %v438_v32 = vpack.i.bf16 %v74_v31, %v58_v30  ;;  %v440_v35 = vpack.i.bf16 %v75_v34, %v59_v33  ;;  %v442_v38 = vpack.i.bf16 %v76_v37, %v60_v36  ;;  %v61_v39 = vld [vmem:[%s916_s1 + $0x58] sm:$0xff]  ;;  %v604_v44 = vld [vmem:[%s915_s0 + $0x70] sm:$0xff]  ;;  %v62_v45 = vld [vmem:[%s916_s1 + $0x60] sm:$0xff] }
  0x10   :  { %v77_v40 = vld [vmem:[%s916_s1 + $0xd8] sm:$0xff]  ;;  %v78_v46 = vld [vmem:[%s916_s1 + $0xe0] sm:$0xff]  ;;  %v617_v47 = vld [vmem:[%s915_s0 + $0xf0] sm:$0xff] }
  0x11   :  { %v444_v41 = vpack.i.bf16 %v77_v40, %v61_v39  ;;  %v594_v42 = vld [vmem:[%s915_s0 + $0x78] sm:$0xff]  ;;  %v622_v48 = vld [vmem:[%s915_s0 + $0x68] sm:$0xff]  ;;  %v446_v50 = vpack.i.bf16 %v78_v46, %v62_v45  ;;  %v634_v51 = vld [vmem:[%s915_s0 + $0x60] sm:$0xff] }
  0x12   :  { %154 = vxpose.xlu0.b32.cont [3/6] (short) (narrow) %v84_v10, 8  ;;  %v599_v43 = vld [vmem:[%s915_s0 + $0xf8] sm:$0xff]  ;;  %192 = vmatpush.msra.mxu0 %v594_v42  ;;  %v627_v49 = vld [vmem:[%s915_s0 + $0xe8] sm:$0xff]  ;;  %v639_v52 = vld [vmem:[%s915_s0 + $0xe0] sm:$0xff] }
  0x13   :  { %212 = vmatpush.msra.mxu1 %v599_v43  ;;  %v646_v53 = vld [vmem:[%s915_s0 + $0x58] sm:$0xff]  ;;  %v656_v55 = vld [vmem:[%s915_s0 + $0x128] sm:$0xf]  ;;  %v663_v56 = vld [vmem:[%s915_s0 + $0x120] sm:$0xff] }
  0x14   :  { %193 = vmatpush.msra.mxu0 %v604_v44  ;;  %v651_v54 = vld [vmem:[%s915_s0 + $0xd8] sm:$0xff]  ;;  %v668_v57 = vld [vmem:[%s915_s0 + $0x50] sm:$0xff]  ;;  %408 = vmatpush.msk.msra.mxu2 %vm188_vm0, %v656_v55  ;;  %v63_v59 = vld [vmem:[%s916_s1 + $0x68] sm:$0xff] }
  0x15   :  { %213 = vmatpush.msra.mxu1 %v617_v47  ;;  %v673_v58 = vld [vmem:[%s915_s0 + $0xd0] sm:$0xff]  ;;  %v79_v60 = vld [vmem:[%s916_s1 + $0xe8] sm:$0xff]  ;;  %v687_v61 = vld [vmem:[%s915_s0 + $0x118] sm:$0xff] }
  0x16   :  { %427 = vxpose.xlu1.b32.cont [3/16] (narrow) %v426_v11, 8  ;;  %194 = vmatpush.msra.mxu0 %v622_v48  ;;  %v692_v62 = vld [vmem:[%s915_s0 + $0x48] sm:$0xff]  ;;  %v705_v0 = vld [vmem:[%s915_s0 + $0x110] sm:$0xff]  ;;  %v448_v1 = vpack.i.bf16 %v79_v60, %v63_v59  ;;  %v710_v2 = vld [vmem:[%s915_s0 + $0x40] sm:$0xff] }
  0x17   :  { %214 = vmatpush.msra.mxu1 %v627_v49  ;;  %v697_v63 = vld [vmem:[%s915_s0 + $0xc8] sm:$0xff]  ;;  %243 = vmatpush.msra.mxu2 %v663_v56  ;;  %v715_v3 = vld [vmem:[%s915_s0 + $0xc0] sm:$0xff]  ;;  %v728_v5 = vld [vmem:[%s915_s0 + $0x38] sm:$0xff]  ;;  %v260_v60 = vmul.f32 %v710_v2, %v710_v2 }
  0x18   :  { %195 = vmatpush.msra.mxu0 %v634_v51  ;;  %v723_v4 = vld [vmem:[%s915_s0 + $0x108] sm:$0xff]  ;;  %v733_v6 = vld [vmem:[%s915_s0 + $0xb8] sm:$0xff]  ;;  %v18_v7 = vld [vmem:[%s915_s0 + $0x30] sm:$0xff]  ;;  %v259_v46 = vmul.f32 %v728_v5, %v728_v5 }
  0x19   :  { %215 = vmatpush.msra.mxu1 %v639_v52  ;;  %244 = vmatpush.msra.mxu2 %v687_v61  ;;  %v744_v8 = vld [vmem:[%s915_s0 + $0xb0] sm:$0xff]  ;;  %v17_v11 = vld [vmem:[%s915_s0 + $0x28] sm:$0xff]  ;;  %v15_v16 = vld [vmem:[%s915_s0 + $0x18] sm:$0xff]  ;;  %v258_v40 = vmul.f32 %v18_v7, %v18_v7 }
  0x1a   :  { %155 = vxpose.xlu0.b32.cont [4/6] (short) (narrow) %v85_v14, 8  ;;  %196 = vmatpush.msra.mxu0 %v646_v53  ;;  %v64_v9 = vld [vmem:[%s916_s1 + $0x70] sm:$0xff]  ;;  %v761_v12 = vld [vmem:[%s915_s0 + $0xa8] sm:$0xff]  ;;  %v16_v14 = vld [vmem:[%s915_s0 + $0x20] sm:$0xff]  ;;  %v255_v30 = vmul.f32 %v15_v16, %v15_v16  ;;  %v257_v37 = vmul.f32 %v17_v11, %v17_v11 }
  0x1b   :  { %216 = vmatpush.msra.mxu1 %v651_v54  ;;  %245 = vmatpush.msra.mxu2 %v705_v0  ;;  %v80_v10 = vld [vmem:[%s916_s1 + $0xf0] sm:$0xff]  ;;  %v779_v17 = vld [vmem:[%s915_s0 + $0x98] sm:$0xff]  ;;  %v13_v24 = vld [vmem:[%s915_s0 + $0x8] sm:$0xff]  ;;  %v256_v33 = vmul.f32 %v16_v14, %v16_v14 }
  0x1c   :  { %197 = vmatpush.msra.mxu0 %v668_v57  ;;  %v450_v13 = vpack.i.bf16 %v80_v10, %v64_v9  ;;  %v14_v21 = vld [vmem:[%s915_s0 + $0x10] sm:$0xff]  ;;  %v29_v25 = vld [vmem:[%s915_s0 + $0x88] sm:$0xff]  ;;  %v253_v27 = vmul.f32 %v13_v24, %v13_v24  ;;  %v12_v28 = vld [vmem:[%s915_s0] sm:$0xff]  ;;  %v261_v10 = vmul.f32 %v692_v62, %v692_v62 }
  0x1d   :  { %217 = vmatpush.msra.mxu1 %v673_v58  ;;  %246 = vmatpush.msra.mxu2 %v723_v4  ;;  %v252_v31 = vmul.f32 %v12_v28, %v12_v28 }
  0x1e   :  { %429 = vxpose.xlu1.b32.cont [4/16] (narrow) %v428_v15, 8  ;;  %198 = vmatpush.msra.mxu0 %v692_v62  ;;  %v770_v15 = vld [vmem:[%s915_s0 + $0xa0] sm:$0xff] }
  0x1f   :  { %218 = vmatpush.msra.mxu1 %v697_v63 }
  0x20   :  { %199 = vmatpush.msra.mxu0 %v710_v2  ;;  %v308_v2 = vsel %vm290_vm1, %v261_v10, 0.0  ;;  %v275_v10 = vmul.f32 %v733_v6, %v733_v6 }
  0x21   :  { %219 = vmatpush.msra.mxu1 %v715_v3 }
  0x22   :  { %156 = vxpose.xlu0.b32.cont [5/6] (short) (narrow) %v86_v18, 8  ;;  %200 = vmatpush.msra.mxu0 %v728_v5  ;;  %v65_v18 = vld [vmem:[%s916_s1 + $0x78] sm:$0xff]  ;;  %v306_v5 = vsel %vm290_vm1, %v260_v60, 0.0 }
  0x23   :  { %220 = vmatpush.msra.mxu1 %v733_v6 }
  0x24   :  { %201 = vmatpush.msra.mxu0 %v18_v7  ;;  %v304_v7 = vsel %vm290_vm1, %v259_v46, 0.0 }
  0x25   :  { %221 = vmatpush.msra.mxu1 %v744_v8 }
  0x26   :  { %431 = vxpose.xlu1.b32.cont [5/16] (narrow) %v430_v19, 8  ;;  %202 = vmatpush.msra.mxu0 %v17_v11  ;;  %v81_v19 = vld [vmem:[%s916_s1 + $0xf8] sm:$0xff] }
  0x27   :  { %222 = vmatpush.msra.mxu1 %v761_v12  ;;  %v452_v20 = vpack.i.bf16 %v81_v19, %v65_v18  ;;  %v264_v19 = vmul.f32 %v634_v51, %v634_v51 }
  0x28   :  { %203 = vmatpush.msra.mxu0 %v16_v14 }
  0x29   :  { %223 = vmatpush.msra.mxu1 %v770_v15 }
  0x2a   :  { %157 = vxpose.xlu0.b32.end [6/6] (short) (narrow) %v87_v22, 8  ;;  %204 = vmatpush.msra.mxu0 %v15_v16  ;;  %v795_v22 = vld [vmem:[%s915_s0 + $0x90] sm:$0xff]  ;;  %v263_v16 = vmul.f32 %v646_v53, %v646_v53  ;;  %v314_v53 = vsel %vm290_vm1, %v264_v19, 0.0 }
  0x2b   :  { %224 = vmatpush.msra.mxu1 %v779_v17 }
  0x2c   :  { %205 = vmatpush.msra.mxu0 %v14_v21 }
  0x2d   :  { %225 = vmatpush.msra.mxu1 %v795_v22 }
  0x2e   :  { %433 = vxpose.xlu1.b32.cont [6/16] (narrow) %v432_v23, 8  ;;  %v800_v23 = vld [vmem:[%s915_s0 + $0x100] sm:$0xff]  ;;  %206 = vmatpush.msra.mxu0 %v13_v24 }
  0x2f   :  { %247 = vmatpush.msra.mxu2 %v800_v23  ;;  %226 = vmatpush.msra.mxu1 %v29_v25 }
  0x30   :  { %207 = vmatpush.msra.mxu0 %v12_v28  ;;  %v267_v28 = vmul.f32 %v594_v42, %v594_v42 }
  0x36   :  { %435 = vxpose.xlu1.b32.cont [7/16] (narrow) %v434_v26, 8  ;;  %v254_v26 = vmul.f32 %v14_v21, %v14_v21  ;;  %v265_v21 = vmul.f32 %v622_v48, %v622_v48 }
  0x38   :  { %v294_v34 = vsel %vm290_vm1, %v254_v26, 0.0  ;;  %v266_v26 = vmul.f32 %v604_v44, %v604_v44  ;;  %v316_v51 = vsel %vm290_vm1, %v265_v21, 0.0  ;;  %v281_v21 = vmul.f32 %v627_v49, %v627_v49 }
  0x39   :  { %v284_v49 = vmul.f32 %v800_v23, %v800_v23  ;;  %v288_v23 = vmul.f32 %v663_v56, %v663_v56 }
  0x3e   :  { %437 = vxpose.xlu1.b32.cont [8/16] (narrow) %v436_v29, 8  ;;  %v28_v29 = vld [vmem:[%s915_s0 + $0x80] sm:$0xff] }
  0x3f   :  { %227 = vmatpush.msra.mxu1 %v28_v29 }
  0x46   :  { %439 = vxpose.xlu1.b32.cont [9/16] (narrow) %v438_v32, 8  ;;  %v292_v32 = vsel %vm290_vm1, %v253_v27, 0.0 }
  0x4e   :  { %441 = vxpose.xlu1.b32.cont [10/16] (narrow) %v440_v35, 8  ;;  %v291_v35 = vsel %vm290_vm1, %v252_v31, 0.0  ;;  %v318_v31 = vsel %vm290_vm1, %v266_v26, 0.0 }
  0x4f   :  { %v293_v36 = vadd.f32 %v292_v32, %v291_v35  ;;  %v268_v32 = vmul.f32 %v28_v29, %v28_v29  ;;  %v269_v35 = vmul.f32 %v29_v25, %v29_v25  ;;  %v272_v25 = vmul.f32 %v770_v15, %v770_v15 }
  0x51   :  { %v295_v39 = vadd.f32 %v294_v34, %v293_v36  ;;  %v270_v36 = vmul.f32 %v795_v22, %v795_v22  ;;  %v322_v42 = vsel %vm290_vm1, %v268_v32, 0.0  ;;  %v324_v29 = vsel %vm290_vm1, %v269_v35, 0.0 }
  0x52   :  { %v286_v32 = vmul.f32 %v705_v0, %v705_v0 }
  0x53   :  { %v326_v46 = vsel %vm290_vm1, %v270_v36, 0.0 }
  0x56   :  { %443 = vxpose.xlu1.b32.cont [11/16] (narrow) %v442_v38, 8  ;;  %v296_v38 = vsel %vm290_vm1, %v255_v30, 0.0 }
  0x57   :  { %v297_v45 = vadd.f32 %v296_v38, %v295_v39 }
  0x5e   :  { %445 = vxpose.xlu1.b32.cont [12/16] (narrow) %v444_v41, 8  ;;  %v298_v41 = vsel %vm290_vm1, %v256_v33, 0.0  ;;  %v320_v33 = vsel %vm290_vm1, %v267_v28, 0.0 }
  0x5f   :  { %v299_v59 = vadd.f32 %v298_v41, %v297_v45 }
  0x66   :  { %447 = vxpose.xlu1.b32.cont [13/16] (narrow) %v446_v50, 8  ;;  %v300_v50 = vsel %vm290_vm1, %v257_v37, 0.0 }
  0x67   :  { %v301_v9 = vadd.f32 %v300_v50, %v299_v59  ;;  %v273_v50 = vmul.f32 %v761_v12, %v761_v12 }
  0x69   :  { %v332_v15 = vsel %vm290_vm1, %v273_v50, 0.0 }
  0x6e   :  { %449 = vxpose.xlu1.b32.cont [14/16] (narrow) %v448_v1, 8  ;;  %v302_v1 = vsel %vm290_vm1, %v258_v40, 0.0  ;;  %v271_v40 = vmul.f32 %v779_v17, %v779_v17  ;;  %v274_v17 = vmul.f32 %v744_v8, %v744_v8  ;;  %v336_v8 = vsel %vm290_vm1, %v275_v10, 0.0 }
  0x6f   :  { %v303_v11 = vadd.f32 %v302_v1, %v301_v9  ;;  %v330_v1 = vsel %vm290_vm1, %v272_v25, 0.0 }
  0x70   :  { %v328_v59 = vsel %vm290_vm1, %v271_v40, 0.0  ;;  %v334_v12 = vsel %vm290_vm1, %v274_v17, 0.0 }
  0x71   :  { %v305_v14 = vadd.f32 %v304_v7, %v303_v11  ;;  %v276_v11 = vmul.f32 %v715_v3, %v715_v3 }
  0x73   :  { %v307_v18 = vadd.f32 %v306_v5, %v305_v14  ;;  %v277_v5 = vmul.f32 %v697_v63, %v697_v63  ;;  %v338_v6 = vsel %vm290_vm1, %v276_v11, 0.0 }
  0x75   :  { %v340_v3 = vsel %vm290_vm1, %v277_v5, 0.0 }
  0x76   :  { %451 = vxpose.xlu1.b32.cont [15/16] (narrow) %v450_v13, 8  ;;  %v262_v13 = vmul.f32 %v668_v57, %v668_v57  ;;  %v312_v57 = vsel %vm290_vm1, %v263_v16, 0.0  ;;  %v278_v16 = vmul.f32 %v673_v58, %v673_v58 }
  0x78   :  { %v310_v62 = vsel %vm290_vm1, %v262_v13, 0.0  ;;  %v342_v63 = vsel %vm290_vm1, %v278_v16, 0.0 }
  0x7e   :  { %453 = vxpose.xlu1.b32.end [16/16] (narrow) %v452_v20, 8  ;;  %v309_v20 = vadd.f32 %v308_v2, %v307_v18  ;;  %v279_v18 = vmul.f32 %v651_v54, %v651_v54 }
  0x80   :  { %v311_v24 = vadd.f32 %v310_v62, %v309_v20  ;;  %v280_v62 = vmul.f32 %v639_v52, %v639_v52  ;;  %v344_v58 = vsel %vm290_vm1, %v279_v18, 0.0  ;;  %v348_v52 = vsel %vm290_vm1, %v281_v21, 0.0 }
  0x82   :  { %v313_v27 = vadd.f32 %v312_v57, %v311_v24  ;;  %v282_v24 = vmul.f32 %v617_v47, %v617_v47  ;;  %v346_v54 = vsel %vm290_vm1, %v280_v62, 0.0  ;;  %v285_v47 = vmul.f32 %v723_v4, %v723_v4 }
  0x83   :  { %v289_v4 = vmul.f32 %v656_v55, %v656_v55 }
  0x84   :  { %v315_v30 = vadd.f32 %v314_v53, %v313_v27  ;;  %v283_v53 = vmul.f32 %v599_v43, %v599_v43  ;;  %v350_v28 = vsel %vm290_vm1, %v282_v24, 0.0  ;;  %v354_v43 = vsel %vm290_vm1, %v284_v49, 0.0 }
  0x86   :  { %v317_v48 = vadd.f32 %v316_v51, %v315_v30  ;;  %v352_v30 = vsel %vm290_vm1, %v283_v53, 0.0 }
  0x88   :  { %v319_v44 = vadd.f32 %v318_v31, %v317_v48 }
  0x8a   :  { %v321_v38 = vadd.f32 %v320_v33, %v319_v44  ;;  %v287_v33 = vmul.f32 %v687_v61, %v687_v61  ;;  %v358_v44 = vsel %vm290_vm1, %v286_v32, 0.0  ;;  %v365_v61 = vsel %vm364_vm3, %v289_v4, 0.0 }
  0x8c   :  { %v323_v45 = vadd.f32 %v322_v42, %v321_v38  ;;  %v360_v0 = vsel %vm290_vm1, %v287_v33, 0.0  ;;  %v362_v42 = vsel %vm290_vm1, %v288_v23, 0.0 }
  0x8e   :  { %v325_v22 = vadd.f32 %v324_v29, %v323_v45 }
  0x90   :  { %v327_v60 = vadd.f32 %v326_v46, %v325_v22 }
  0x92   :  { %v329_v9 = vadd.f32 %v328_v59, %v327_v60 }
  0x94   :  { %v331_v7 = vadd.f32 %v330_v1, %v329_v9 }
  0x96   :  { %v333_v13 = vadd.f32 %v332_v15, %v331_v7 }
  0x98   :  { %v335_v14 = vadd.f32 %v334_v12, %v333_v13 }
  0x9a   :  { %v337_v2 = vadd.f32 %v336_v8, %v335_v14 }
  0x9c   :  { %v339_v19 = vadd.f32 %v338_v6, %v337_v2 }
  0x9e   :  { %v341_v20 = vadd.f32 %v340_v3, %v339_v19 }
  0xa0   :  { %v343_v57 = vadd.f32 %v342_v63, %v341_v20 }
  0xa2   :  { %v345_v26 = vadd.f32 %v344_v58, %v343_v57 }
  0xa4   :  { %v347_v27 = vadd.f32 %v346_v54, %v345_v26 }
  0xa6   :  { %v168_v34 = vpop.trf.xlu0  ;;  %v349_v51 = vadd.f32 %v348_v52, %v347_v27 }
  0xa7   :  { %409 = vmatmul.msk.f32.vlgmr.msra.gmra.mxu2 %vm184_vm2, %v168_v34  ;;  %v356_v34 = vsel %vm290_vm1, %v285_v47, 0.0 }
  0xa8   :  { %v351_v31 = vadd.f32 %v350_v28, %v349_v51 }
  0xaa   :  { %v454_v37 = vpop.trf.xlu1  ;;  %v353_v48 = vadd.f32 %v352_v30, %v351_v31 }
  0xab   :  { %v455_v39 = vunpack.i.l.bf16 %v454_v37  ;;  %v458_v41 = vunpack.i.h.bf16 %v454_v37 }
  0xac   :  { %v355_v35 = vadd.f32 %v354_v43, %v353_v48 }
  0xad   :  { %208 = vmatmul.f32.vlgmr.msra.gmra.mxu0 %v455_v39  ;;  %228 = vmatmul.f32.vlgmr.msra.gmra.mxu1 %v458_v41 }
  0xae   :  { %v357_v36 = vadd.f32 %v356_v34, %v355_v35 }
  0xb0   :  { %v359_v37 = vadd.f32 %v358_v44, %v357_v36 }
  0xb2   :  { %v361_v38 = vadd.f32 %v360_v0, %v359_v37 }
  0xb4   :  { %v363_v39 = vadd.f32 %v362_v42, %v361_v38 }
  0xb6   :  { %v366_v40 = vadd.f32 %v365_v61, %v363_v39 }
  0xb8   :  { %367 = vadd.xlane.f32.xlu2 %v366_v40 }
 0x12a   :  { %v209_v29 = vpop.f32.mrf.mxu0  ;;  %v229_v41 = vpop.f32.mrf.mxu1 }
 0x12b   :  { %v230_v56 = vadd.f32 %v229_v41, %v209_v29  ;;  %v249_v45 = vpop.f32.mrf.mxu2  ;;  %v368_v55 = vpop.xlane.xlu2 %367 }
 0x12c   :  { %v369_v50 = vrot.slane %v368_v55, 4 }
 0x12d   :  { %v250_v25 = vadd.f32 %v249_v45, %v230_v56 }
 0x12e   :  { %v370_v59 = vadd.f32 %v369_v50, %v368_v55 }
 0x12f   :  { %v377_v46 = vmul.f32 %v250_v25, %v250_v25 }
 0x130   :  { %v371_v60 = vrot.slane %v370_v59, 2 }
 0x131   :  { %v378_v22 = vsel %vm290_vm1, %v377_v46, 0.0 }
 0x132   :  { %379 = vadd.xlane.f32.xlu2 %v378_v22  ;;  %v372_v17 = vadd.f32 %v371_v60, %v370_v59 }
 0x134   :  { %v373_v1 = vrot.slane %v372_v17, 1 }
 0x136   :  { %v374_v9 = vadd.f32 %v373_v1, %v372_v17 }
 0x138   :  { %416 = vpush %v374_v9 }
 0x169   :  { %s417_s0 = spop %416 }
 0x16a   :  { %v376_v8 = vstv %s417_s0 }
 0x1a5   :  { %v380_v10 = vpop.xlane.xlu2 %379 }
 0x1a6   :  { %v381_v15 = vrot.slane %v380_v10, 4 }
 0x1a8   :  { %v382_v7 = vadd.f32 %v381_v15, %v380_v10 }
 0x1aa   :  { %v383_v11 = vrot.slane %v382_v7, 2 }
 0x1ac   :  { %v384_v12 = vadd.f32 %v383_v11, %v382_v7 }
 0x1ae   :  { %v385_v13 = vrot.slane %v384_v12, 1 }
 0x1b0   :  { %v386_v5 = vadd.f32 %v385_v13, %v384_v12 }
 0x1b2   :  { %418 = vpush %v386_v5 }
 0x1e3   :  { %s419_s25 = spop %418 }
 0x1e4   :  { %v388_v14 = vstv %s419_s25 }
 0x1e5   :  { %v389_v16 = vsub.f32 %v376_v8, %v388_v14 }
 0x1e7   :  { %391 = vst.msk [vmem:[#allocation2] sm:$0x1] %vm390_vm4, %v389_v16 }
 0x1e8   :  { %402 = dma.vmem_to_hbm [thread:$0]  %s398_s21, 16, %s400_s24, [#allocation3]  }
 0x1e9   :  { %483 = dma.done.wait [#allocation3], 16  }
 0x1ea   :  { %484 = vsyncadd [#allocation3], 4294967280 }
 0x1eb   :  { %407 = vsyncpa [#allocation3], 1 }

</bundles_post_ra>
